<compile_context>
chip_gen: v7x
topology: tpu7x:2x2x1
jax: 0.10.0
libtpu: 0.0.40
codegen_flags: <defaults>
</compile_context>

<pallas_src>
import functools

import jax
import jax.numpy as jnp
from jax.experimental import pallas as pl
from jax.experimental.pallas import tpu as pltpu


def joint_1dof_kernel(params_ref, ss_ref, alpha_ref, ss_out_ref,
                      *, muscle_num, I, Bj, Kj, dt):
    """One Euler step for a lane-dense (2, block_batch) state tile."""
    pos = ss_ref[0:1, :]                          # (1, bt)
    vel = ss_ref[1:2, :]                          # (1, bt)
    abs_pos = jnp.abs(pos)

    inv_I = 1.0 / I

    k_sum = jnp.zeros_like(pos)
    b10 = jnp.zeros_like(pos)
    # muscle_num is tiny -> static unroll; per-muscle scalars come from SMEM, and the
    # reductions become VPU-only multiply-adds (no XLU cross-lane reduce).
    for m in range(muscle_num):
        a = jnp.clip(alpha_ref[m:m + 1, :], 0.0, 1.0)        # (1, bt)
        k0 = params_ref[0, m]
        k1 = params_ref[1, m]
        l0 = params_ref[2, m]
        l1 = params_ref[3, m]
        m2 = params_ref[4, m]          # M^2
        m_over_i = params_ref[5, m]    # M / I
        k1l1 = params_ref[6, m]        # K1 * L1
        abs_m = params_ref[7, m]       # |M|

        k_mus = k0 + k1 * a                                   # (1, bt)
        k_sum = k_sum + k_mus * m2
        b_f = k_mus * (l0 + l1 * a - abs_m * abs_pos) + k1l1 * a * a
        b10 = b10 + b_f * m_over_i

    a10 = -(k_sum + Kj) * inv_I
    a11 = -(jnp.sqrt(k_sum * I) * 2.0 + Bj) * inv_I

    # speed_mode Euler step:  SSout = (A*dt) @ SS + (B*dt) @ U0 + SS,  U0 = [1, 0]
    new_pos = pos + dt * vel
    new_vel = vel + dt * (a10 * pos + a11 * vel + b10)

    # Single lane-dense full-tile store.
    ss_out_ref[...] = jnp.concatenate([new_pos, new_vel], axis=0)


def joint_1dof_forward(ss, alphas, k0s, k1s, l0s, l1s, ms,
                       *, I, Bj, Kj, dt, block_batch=None):
    ss = jnp.asarray(ss, jnp.float32)
    alphas = jnp.asarray(alphas, jnp.float32)
    batch = ss.shape[0]
    mnum = alphas.shape[1]

    k0 = jnp.asarray(k0s, jnp.float32).reshape(mnum)
    k1 = jnp.asarray(k1s, jnp.float32).reshape(mnum)
    l0 = jnp.asarray(l0s, jnp.float32).reshape(mnum)
    l1 = jnp.asarray(l1s, jnp.float32).reshape(mnum)
    m = jnp.asarray(ms, jnp.float32).reshape(mnum)

    # One packed per-muscle parameter table (lives in SMEM inside the kernel);
    # derived constants precomputed once here.
    params = jnp.stack(
        [k0, k1, l0, l1, m * m, m / jnp.float32(I), k1 * l1, jnp.abs(m)],
        axis=0)                                              # (8, M)

    # Lane-dense layout: batch on the last (lane) axis.
    ss_t = ss.T                                              # (2, batch)
    alphas_t = alphas.T                                      # (M, batch)

    if block_batch is None:
        # Whole batch in one tile for small problems; large lane-dense tiles otherwise
        # (2048 rows keeps double-buffered tiles far under any scoped-VMEM limit).
        block_batch = batch if batch <= 2048 else 2048

    n_blocks = pl.cdiv(batch, block_batch)
    padded = n_blocks * block_batch
    if padded != batch:
        pad = padded - batch
        ss_t = jnp.pad(ss_t, ((0, 0), (0, pad)))
        alphas_t = jnp.pad(alphas_t, ((0, 0), (0, pad)))

    kernel = functools.partial(
        joint_1dof_kernel, muscle_num=mnum,
        I=float(I), Bj=float(Bj), Kj=float(Kj), dt=float(dt))

    batch_map = lambda i: (0, i)

    ss_out_t = pl.pallas_call(
        kernel,
        grid=(n_blocks,),
        in_specs=[
            pl.BlockSpec(memory_space=pltpu.MemorySpace.SMEM),   # packed params (8, M)
            pl.BlockSpec((2, block_batch), batch_map),           # SS^T
            pl.BlockSpec((mnum, block_batch), batch_map),        # Alphas^T
        ],
        out_specs=pl.BlockSpec((2, block_batch), batch_map),
        out_shape=jax.ShapeDtypeStruct((2, padded), jnp.float32),
        compiler_params=pltpu.CompilerParams(
            dimension_semantics=("parallel",)),
    )(params, ss_t, alphas_t)

    ss_out = ss_out_t[:, :batch].T                               # (batch, 2)
    return ss_out[:, 0:1], ss_out


def joint_1dof_ref(ss, alphas, k0s, k1s, l0s, l1s, ms, I, Bj, Kj, dt):
    """Pure-JAX reference mirroring the PyTorch forward (speed_mode=True)."""
    a = jnp.clip(alphas, 0.0, 1.0)
    k0, k1, l0, l1, m = (p[None, :] for p in (k0s, k1s, l0s, l1s, ms))
    pos = ss[:, 0:1]
    vel = ss[:, 1:2]
    k_mus = k0 + k1 * a
    k_sum = jnp.sum(k_mus * m * m, axis=1, keepdims=True)
    a10 = -(k_sum + Kj) / I
    a11 = -(jnp.sqrt(k_sum * I) * 2.0 + Bj) / I
    b_f = k_mus * (l0 + l1 * a - jnp.abs(pos * m)) + k1 * l1 * a * a
    b10 = jnp.sum(b_f * m / I, axis=1, keepdims=True)
    new_pos = pos + dt * vel
    new_vel = vel + dt * (a10 * pos + a11 * vel + b10)
    ss_out = jnp.concatenate([new_pos, new_vel], axis=-1)
    return ss_out[:, 0:1], ss_out


if __name__ == "__main__":
    batch, muscle_num = 16, 4
    key = jax.random.PRNGKey(0)
    k_ss, k_alpha = jax.random.split(key)

    # Inputs (deterministic).
    SS = jax.random.normal(k_ss, (batch, 2), dtype=jnp.float32) * 0.1      # [pos, speed]
    Alphas = jax.random.uniform(k_alpha, (batch, muscle_num), dtype=jnp.float32)

    # Deterministic "muscle" parameters (shapes per the module __init__).
    K0s = jnp.array([100.0, 110.0, 120.0, 130.0], jnp.float32)
    K1s = jnp.array([2000.0, 2100.0, 2200.0, 2300.0], jnp.float32)
    L0s = jnp.array([0.060, 0.060, 0.050, 0.050], jnp.float32)
    L1s = jnp.array([0.006, 0.006, 0.005, 0.005], jnp.float32)
    Ms = jnp.array([0.05, -0.05, 0.03, -0.03], jnp.float32)
    I_param, B_param, K_param = 0.004, 0.3, 5.0
    dt = 1.0 / 60.0

    out_pos, out_ss = joint_1dof_forward(
        SS, Alphas, K0s, K1s, L0s, L1s, Ms,
        I=I_param, Bj=B_param, Kj=K_param, dt=dt)
    jax.block_until_ready((out_pos, out_ss))

    ref_pos, ref_ss = joint_1dof_ref(SS, Alphas, K0s, K1s, L0s, L1s, Ms,
                                     I_param, B_param, K_param, dt)

    assert out_pos.shape == (batch, 1) and out_ss.shape == (batch, 2)
    assert jnp.allclose(out_pos, ref_pos, atol=1e-4, rtol=1e-4)
    assert jnp.allclose(out_ss, ref_ss, atol=1e-4, rtol=1e-4)
    print("KERNEL_OK")
</pallas_src>

<mosaic_0001>
module attributes {stable_mosaic.version = 11 : i64} {
  func.func @joint_1dof_kernel(%arg0: i32, %arg1: memref<8x4xf32, #tpu.memory_space<smem>>, %arg2: memref<2x16xf32, #tpu.memory_space<vmem>>, %arg3: memref<4x16xf32, #tpu.memory_space<vmem>>, %arg4: memref<2x16xf32, #tpu.memory_space<vmem>>) attributes {dimension_semantics = [#tpu.dimension_semantics<parallel>], iteration_bounds = array<i64: 1>, scalar_prefetch = 0 : i64, scratch_operands = 0 : i64, tpu.core_type = #tpu.core_type<tc>, window_params = [{transform_indices = @transform_0, window_bounds = array<i64: 8, 4>}, {transform_indices = @transform_1, window_bounds = array<i64: 2, 16>}, {transform_indices = @transform_2, window_bounds = array<i64: 4, 16>}, {transform_indices = @transform_3, window_bounds = array<i64: 2, 16>}]} {
    %c0 = arith.constant 0 : index
    %c0_0 = arith.constant 0 : index
    %0 = vector.load %arg2[%c0, %c0_0] : memref<2x16xf32, #tpu.memory_space<vmem>>, vector<1x16xf32>
    %c1 = arith.constant 1 : index
    %c0_1 = arith.constant 0 : index
    %1 = vector.load %arg2[%c1, %c0_1] : memref<2x16xf32, #tpu.memory_space<vmem>>, vector<1x16xf32>
    %2 = math.absf %0 : vector<1x16xf32>
    %cst = arith.constant 0.000000e+00 : f32
    %3 = vector.broadcast %cst : f32 to vector<1x16xf32>
    %cst_2 = arith.constant 0.000000e+00 : f32
    %4 = vector.broadcast %cst_2 : f32 to vector<1x16xf32>
    %c0_3 = arith.constant 0 : index
    %c0_4 = arith.constant 0 : index
    %5 = vector.load %arg3[%c0_3, %c0_4] : memref<4x16xf32, #tpu.memory_space<vmem>>, vector<1x16xf32>
    %cst_5 = arith.constant 0.000000e+00 : f32
    %cst_6 = arith.constant 1.000000e+00 : f32
    %6 = vector.broadcast %cst_5 : f32 to vector<1x16xf32>
    %7 = arith.maximumf %6, %5 : vector<1x16xf32>
    %8 = vector.broadcast %cst_6 : f32 to vector<1x16xf32>
    %9 = arith.minimumf %8, %7 : vector<1x16xf32>
    %c0_7 = arith.constant 0 : index
    %c0_8 = arith.constant 0 : index
    %10 = memref.load %arg1[%c0_7, %c0_8] : memref<8x4xf32, #tpu.memory_space<smem>>
    %c1_9 = arith.constant 1 : index
    %c0_10 = arith.constant 0 : index
    %11 = memref.load %arg1[%c1_9, %c0_10] : memref<8x4xf32, #tpu.memory_space<smem>>
    %c2 = arith.constant 2 : index
    %c0_11 = arith.constant 0 : index
    %12 = memref.load %arg1[%c2, %c0_11] : memref<8x4xf32, #tpu.memory_space<smem>>
    %c3 = arith.constant 3 : index
    %c0_12 = arith.constant 0 : index
    %13 = memref.load %arg1[%c3, %c0_12] : memref<8x4xf32, #tpu.memory_space<smem>>
    %c4 = arith.constant 4 : index
    %c0_13 = arith.constant 0 : index
    %14 = memref.load %arg1[%c4, %c0_13] : memref<8x4xf32, #tpu.memory_space<smem>>
    %c5 = arith.constant 5 : index
    %c0_14 = arith.constant 0 : index
    %15 = memref.load %arg1[%c5, %c0_14] : memref<8x4xf32, #tpu.memory_space<smem>>
    %c6 = arith.constant 6 : index
    %c0_15 = arith.constant 0 : index
    %16 = memref.load %arg1[%c6, %c0_15] : memref<8x4xf32, #tpu.memory_space<smem>>
    %c7 = arith.constant 7 : index
    %c0_16 = arith.constant 0 : index
    %17 = memref.load %arg1[%c7, %c0_16] : memref<8x4xf32, #tpu.memory_space<smem>>
    %18 = vector.broadcast %11 : f32 to vector<1x16xf32>
    %19 = arith.mulf %18, %9 : vector<1x16xf32>
    %20 = vector.broadcast %10 : f32 to vector<1x16xf32>
    %21 = arith.addf %20, %19 : vector<1x16xf32>
    %22 = vector.broadcast %14 : f32 to vector<1x16xf32>
    %23 = arith.mulf %21, %22 : vector<1x16xf32>
    %24 = arith.addf %3, %23 : vector<1x16xf32>
    %25 = vector.broadcast %13 : f32 to vector<1x16xf32>
    %26 = arith.mulf %25, %9 : vector<1x16xf32>
    %27 = vector.broadcast %12 : f32 to vector<1x16xf32>
    %28 = arith.addf %27, %26 : vector<1x16xf32>
    %29 = vector.broadcast %17 : f32 to vector<1x16xf32>
    %30 = arith.mulf %29, %2 : vector<1x16xf32>
    %31 = arith.subf %28, %30 : vector<1x16xf32>
    %32 = arith.mulf %21, %31 : vector<1x16xf32>
    %33 = vector.broadcast %16 : f32 to vector<1x16xf32>
    %34 = arith.mulf %33, %9 : vector<1x16xf32>
    %35 = arith.mulf %34, %9 : vector<1x16xf32>
    %36 = arith.addf %32, %35 : vector<1x16xf32>
    %37 = vector.broadcast %15 : f32 to vector<1x16xf32>
    %38 = arith.mulf %36, %37 : vector<1x16xf32>
    %39 = arith.addf %4, %38 : vector<1x16xf32>
    %c1_17 = arith.constant 1 : index
    %c0_18 = arith.constant 0 : index
    %40 = vector.load %arg3[%c1_17, %c0_18] : memref<4x16xf32, #tpu.memory_space<vmem>>, vector<1x16xf32>
    %cst_19 = arith.constant 0.000000e+00 : f32
    %cst_20 = arith.constant 1.000000e+00 : f32
    %41 = vector.broadcast %cst_19 : f32 to vector<1x16xf32>
    %42 = arith.maximumf %41, %40 : vector<1x16xf32>
    %43 = vector.broadcast %cst_20 : f32 to vector<1x16xf32>
    %44 = arith.minimumf %43, %42 : vector<1x16xf32>
    %c0_21 = arith.constant 0 : index
    %c1_22 = arith.constant 1 : index
    %45 = memref.load %arg1[%c0_21, %c1_22] : memref<8x4xf32, #tpu.memory_space<smem>>
    %c1_23 = arith.constant 1 : index
    %c1_24 = arith.constant 1 : index
    %46 = memref.load %arg1[%c1_23, %c1_24] : memref<8x4xf32, #tpu.memory_space<smem>>
    %c2_25 = arith.constant 2 : index
    %c1_26 = arith.constant 1 : index
    %47 = memref.load %arg1[%c2_25, %c1_26] : memref<8x4xf32, #tpu.memory_space<smem>>
    %c3_27 = arith.constant 3 : index
    %c1_28 = arith.constant 1 : index
    %48 = memref.load %arg1[%c3_27, %c1_28] : memref<8x4xf32, #tpu.memory_space<smem>>
    %c4_29 = arith.constant 4 : index
    %c1_30 = arith.constant 1 : index
    %49 = memref.load %arg1[%c4_29, %c1_30] : memref<8x4xf32, #tpu.memory_space<smem>>
    %c5_31 = arith.constant 5 : index
    %c1_32 = arith.constant 1 : index
    %50 = memref.load %arg1[%c5_31, %c1_32] : memref<8x4xf32, #tpu.memory_space<smem>>
    %c6_33 = arith.constant 6 : index
    %c1_34 = arith.constant 1 : index
    %51 = memref.load %arg1[%c6_33, %c1_34] : memref<8x4xf32, #tpu.memory_space<smem>>
    %c7_35 = arith.constant 7 : index
    %c1_36 = arith.constant 1 : index
    %52 = memref.load %arg1[%c7_35, %c1_36] : memref<8x4xf32, #tpu.memory_space<smem>>
    %53 = vector.broadcast %46 : f32 to vector<1x16xf32>
    %54 = arith.mulf %53, %44 : vector<1x16xf32>
    %55 = vector.broadcast %45 : f32 to vector<1x16xf32>
    %56 = arith.addf %55, %54 : vector<1x16xf32>
    %57 = vector.broadcast %49 : f32 to vector<1x16xf32>
    %58 = arith.mulf %56, %57 : vector<1x16xf32>
    %59 = arith.addf %24, %58 : vector<1x16xf32>
    %60 = vector.broadcast %48 : f32 to vector<1x16xf32>
    %61 = arith.mulf %60, %44 : vector<1x16xf32>
    %62 = vector.broadcast %47 : f32 to vector<1x16xf32>
    %63 = arith.addf %62, %61 : vector<1x16xf32>
    %64 = vector.broadcast %52 : f32 to vector<1x16xf32>
    %65 = arith.mulf %64, %2 : vector<1x16xf32>
    %66 = arith.subf %63, %65 : vector<1x16xf32>
    %67 = arith.mulf %56, %66 : vector<1x16xf32>
    %68 = vector.broadcast %51 : f32 to vector<1x16xf32>
    %69 = arith.mulf %68, %44 : vector<1x16xf32>
    %70 = arith.mulf %69, %44 : vector<1x16xf32>
    %71 = arith.addf %67, %70 : vector<1x16xf32>
    %72 = vector.broadcast %50 : f32 to vector<1x16xf32>
    %73 = arith.mulf %71, %72 : vector<1x16xf32>
    %74 = arith.addf %39, %73 : vector<1x16xf32>
    %c2_37 = arith.constant 2 : index
    %c0_38 = arith.constant 0 : index
    %75 = vector.load %arg3[%c2_37, %c0_38] : memref<4x16xf32, #tpu.memory_space<vmem>>, vector<1x16xf32>
    %cst_39 = arith.constant 0.000000e+00 : f32
    %cst_40 = arith.constant 1.000000e+00 : f32
    %76 = vector.broadcast %cst_39 : f32 to vector<1x16xf32>
    %77 = arith.maximumf %76, %75 : vector<1x16xf32>
    %78 = vector.broadcast %cst_40 : f32 to vector<1x16xf32>
    %79 = arith.minimumf %78, %77 : vector<1x16xf32>
    %c0_41 = arith.constant 0 : index
    %c2_42 = arith.constant 2 : index
    %80 = memref.load %arg1[%c0_41, %c2_42] : memref<8x4xf32, #tpu.memory_space<smem>>
    %c1_43 = arith.constant 1 : index
    %c2_44 = arith.constant 2 : index
    %81 = memref.load %arg1[%c1_43, %c2_44] : memref<8x4xf32, #tpu.memory_space<smem>>
    %c2_45 = arith.constant 2 : index
    %c2_46 = arith.constant 2 : index
    %82 = memref.load %arg1[%c2_45, %c2_46] : memref<8x4xf32, #tpu.memory_space<smem>>
    %c3_47 = arith.constant 3 : index
    %c2_48 = arith.constant 2 : index
    %83 = memref.load %arg1[%c3_47, %c2_48] : memref<8x4xf32, #tpu.memory_space<smem>>
    %c4_49 = arith.constant 4 : index
    %c2_50 = arith.constant 2 : index
    %84 = memref.load %arg1[%c4_49, %c2_50] : memref<8x4xf32, #tpu.memory_space<smem>>
    %c5_51 = arith.constant 5 : index
    %c2_52 = arith.constant 2 : index
    %85 = memref.load %arg1[%c5_51, %c2_52] : memref<8x4xf32, #tpu.memory_space<smem>>
    %c6_53 = arith.constant 6 : index
    %c2_54 = arith.constant 2 : index
    %86 = memref.load %arg1[%c6_53, %c2_54] : memref<8x4xf32, #tpu.memory_space<smem>>
    %c7_55 = arith.constant 7 : index
    %c2_56 = arith.constant 2 : index
    %87 = memref.load %arg1[%c7_55, %c2_56] : memref<8x4xf32, #tpu.memory_space<smem>>
    %88 = vector.broadcast %81 : f32 to vector<1x16xf32>
    %89 = arith.mulf %88, %79 : vector<1x16xf32>
    %90 = vector.broadcast %80 : f32 to vector<1x16xf32>
    %91 = arith.addf %90, %89 : vector<1x16xf32>
    %92 = vector.broadcast %84 : f32 to vector<1x16xf32>
    %93 = arith.mulf %91, %92 : vector<1x16xf32>
    %94 = arith.addf %59, %93 : vector<1x16xf32>
    %95 = vector.broadcast %83 : f32 to vector<1x16xf32>
    %96 = arith.mulf %95, %79 : vector<1x16xf32>
    %97 = vector.broadcast %82 : f32 to vector<1x16xf32>
    %98 = arith.addf %97, %96 : vector<1x16xf32>
    %99 = vector.broadcast %87 : f32 to vector<1x16xf32>
    %100 = arith.mulf %99, %2 : vector<1x16xf32>
    %101 = arith.subf %98, %100 : vector<1x16xf32>
    %102 = arith.mulf %91, %101 : vector<1x16xf32>
    %103 = vector.broadcast %86 : f32 to vector<1x16xf32>
    %104 = arith.mulf %103, %79 : vector<1x16xf32>
    %105 = arith.mulf %104, %79 : vector<1x16xf32>
    %106 = arith.addf %102, %105 : vector<1x16xf32>
    %107 = vector.broadcast %85 : f32 to vector<1x16xf32>
    %108 = arith.mulf %106, %107 : vector<1x16xf32>
    %109 = arith.addf %74, %108 : vector<1x16xf32>
    %c3_57 = arith.constant 3 : index
    %c0_58 = arith.constant 0 : index
    %110 = vector.load %arg3[%c3_57, %c0_58] : memref<4x16xf32, #tpu.memory_space<vmem>>, vector<1x16xf32>
    %cst_59 = arith.constant 0.000000e+00 : f32
    %cst_60 = arith.constant 1.000000e+00 : f32
    %111 = vector.broadcast %cst_59 : f32 to vector<1x16xf32>
    %112 = arith.maximumf %111, %110 : vector<1x16xf32>
    %113 = vector.broadcast %cst_60 : f32 to vector<1x16xf32>
    %114 = arith.minimumf %113, %112 : vector<1x16xf32>
    %c0_61 = arith.constant 0 : index
    %c3_62 = arith.constant 3 : index
    %115 = memref.load %arg1[%c0_61, %c3_62] : memref<8x4xf32, #tpu.memory_space<smem>>
    %c1_63 = arith.constant 1 : index
    %c3_64 = arith.constant 3 : index
    %116 = memref.load %arg1[%c1_63, %c3_64] : memref<8x4xf32, #tpu.memory_space<smem>>
    %c2_65 = arith.constant 2 : index
    %c3_66 = arith.constant 3 : index
    %117 = memref.load %arg1[%c2_65, %c3_66] : memref<8x4xf32, #tpu.memory_space<smem>>
    %c3_67 = arith.constant 3 : index
    %c3_68 = arith.constant 3 : index
    %118 = memref.load %arg1[%c3_67, %c3_68] : memref<8x4xf32, #tpu.memory_space<smem>>
    %c4_69 = arith.constant 4 : index
    %c3_70 = arith.constant 3 : index
    %119 = memref.load %arg1[%c4_69, %c3_70] : memref<8x4xf32, #tpu.memory_space<smem>>
    %c5_71 = arith.constant 5 : index
    %c3_72 = arith.constant 3 : index
    %120 = memref.load %arg1[%c5_71, %c3_72] : memref<8x4xf32, #tpu.memory_space<smem>>
    %c6_73 = arith.constant 6 : index
    %c3_74 = arith.constant 3 : index
    %121 = memref.load %arg1[%c6_73, %c3_74] : memref<8x4xf32, #tpu.memory_space<smem>>
    %c7_75 = arith.constant 7 : index
    %c3_76 = arith.constant 3 : index
    %122 = memref.load %arg1[%c7_75, %c3_76] : memref<8x4xf32, #tpu.memory_space<smem>>
    %123 = vector.broadcast %116 : f32 to vector<1x16xf32>
    %124 = arith.mulf %123, %114 : vector<1x16xf32>
    %125 = vector.broadcast %115 : f32 to vector<1x16xf32>
    %126 = arith.addf %125, %124 : vector<1x16xf32>
    %127 = vector.broadcast %119 : f32 to vector<1x16xf32>
    %128 = arith.mulf %126, %127 : vector<1x16xf32>
    %129 = arith.addf %94, %128 : vector<1x16xf32>
    %130 = vector.broadcast %118 : f32 to vector<1x16xf32>
    %131 = arith.mulf %130, %114 : vector<1x16xf32>
    %132 = vector.broadcast %117 : f32 to vector<1x16xf32>
    %133 = arith.addf %132, %131 : vector<1x16xf32>
    %134 = vector.broadcast %122 : f32 to vector<1x16xf32>
    %135 = arith.mulf %134, %2 : vector<1x16xf32>
    %136 = arith.subf %133, %135 : vector<1x16xf32>
    %137 = arith.mulf %126, %136 : vector<1x16xf32>
    %138 = vector.broadcast %121 : f32 to vector<1x16xf32>
    %139 = arith.mulf %138, %114 : vector<1x16xf32>
    %140 = arith.mulf %139, %114 : vector<1x16xf32>
    %141 = arith.addf %137, %140 : vector<1x16xf32>
    %142 = vector.broadcast %120 : f32 to vector<1x16xf32>
    %143 = arith.mulf %141, %142 : vector<1x16xf32>
    %144 = arith.addf %109, %143 : vector<1x16xf32>
    %cst_77 = arith.constant 5.000000e+00 : f32
    %145 = vector.broadcast %cst_77 : f32 to vector<1x16xf32>
    %146 = arith.addf %129, %145 : vector<1x16xf32>
    %cst_78 = arith.constant 0.000000e+00 : f32
    %147 = vector.broadcast %cst_78 : f32 to vector<1x16xf32>
    %148 = arith.subf %147, %146 : vector<1x16xf32>
    %cst_79 = arith.constant 2.500000e+02 : f32
    %149 = vector.broadcast %cst_79 : f32 to vector<1x16xf32>
    %150 = arith.mulf %148, %149 : vector<1x16xf32>
    %cst_80 = arith.constant 4.000000e-03 : f32
    %151 = vector.broadcast %cst_80 : f32 to vector<1x16xf32>
    %152 = arith.mulf %129, %151 : vector<1x16xf32>
    %153 = math.sqrt %152 : vector<1x16xf32>
    %cst_81 = arith.constant 2.000000e+00 : f32
    %154 = vector.broadcast %cst_81 : f32 to vector<1x16xf32>
    %155 = arith.mulf %153, %154 : vector<1x16xf32>
    %cst_82 = arith.constant 3.000000e-01 : f32
    %156 = vector.broadcast %cst_82 : f32 to vector<1x16xf32>
    %157 = arith.addf %155, %156 : vector<1x16xf32>
    %cst_83 = arith.constant 0.000000e+00 : f32
    %158 = vector.broadcast %cst_83 : f32 to vector<1x16xf32>
    %159 = arith.subf %158, %157 : vector<1x16xf32>
    %cst_84 = arith.constant 2.500000e+02 : f32
    %160 = vector.broadcast %cst_84 : f32 to vector<1x16xf32>
    %161 = arith.mulf %159, %160 : vector<1x16xf32>
    %cst_85 = arith.constant 0.0166666675 : f32
    %162 = vector.broadcast %cst_85 : f32 to vector<1x16xf32>
    %163 = arith.mulf %162, %1 : vector<1x16xf32>
    %164 = arith.addf %0, %163 : vector<1x16xf32>
    %165 = arith.mulf %150, %0 : vector<1x16xf32>
    %166 = arith.mulf %161, %1 : vector<1x16xf32>
    %167 = arith.addf %165, %166 : vector<1x16xf32>
    %168 = arith.addf %167, %144 : vector<1x16xf32>
    %cst_86 = arith.constant 0.0166666675 : f32
    %169 = vector.broadcast %cst_86 : f32 to vector<1x16xf32>
    %170 = arith.mulf %169, %168 : vector<1x16xf32>
    %171 = arith.addf %1, %170 : vector<1x16xf32>
    %172 = tpu.concatenate %164, %171 in 0 : vector<1x16xf32>, vector<1x16xf32> -> vector<2x16xf32>
    %c0_87 = arith.constant 0 : index
    %c0_88 = arith.constant 0 : index
    %173 = vector.load %arg4[%c0_87, %c0_88] : memref<2x16xf32, #tpu.memory_space<vmem>>, vector<2x16xf32>
    tpu.vector_store %arg4[%c0_87, %c0_88], %172 {strides = array<i32>} : memref<2x16xf32, #tpu.memory_space<vmem>>, vector<2x16xf32>,
    return
  }
  func.func @transform_0(%arg0: i32) -> (i32, i32) {
    %c0_i32 = arith.constant 0 : i32
    %c0_i32_0 = arith.constant 0 : i32
    %c0_i32_1 = arith.constant 0 : i32
    return %c0_i32, %c0_i32_0 : i32, i32
  }
  func.func @transform_1(%arg0: i32) -> (i32, i32) {
    %c0_i32 = arith.constant 0 : i32
    %c0_i32_0 = arith.constant 0 : i32
    return %c0_i32, %arg0 : i32, i32
  }
  func.func @transform_2(%arg0: i32) -> (i32, i32) {
    %c0_i32 = arith.constant 0 : i32
    %c0_i32_0 = arith.constant 0 : i32
    return %c0_i32, %arg0 : i32, i32
  }
  func.func @transform_3(%arg0: i32) -> (i32, i32) {
    %c0_i32 = arith.constant 0 : i32
    %c0_i32_0 = arith.constant 0 : i32
    return %c0_i32, %arg0 : i32, i32
  }
}

</mosaic_0001>

<bundles_post_ra>
// kernel: tpu_custom_call.1
= control target key start
LH: loop header
LB: loop body
LE: loop exit
PB: predicated region body
PF: predicated region fallthrough
CT: control target
= control target key end

     0   :  { %8 = vsyncpa [#allocation4], 0  ;;  %s446_s0 = inlined_call_operand.vmem [shape: f32[8,4], index: 0, kind: input, shape index: {}]   ;;  %s447_s1 = inlined_call_operand.vmem [shape: f32[2,16], index: 1, kind: input, shape index: {}]   ;;  %s448_s2 = inlined_call_operand.vmem [shape: f32[4,16], index: 2, kind: input, shape index: {}]   ;;  %s449_s3 = inlined_call_operand.hbm [shape: f32[2,16], index: 3, kind: output, shape index: {}]  }
   0x1   :  { %9 = vsyncpa [#allocation3], 0  ;;  %s16_s14 = sshll.u32 %s446_s0, 4  ;;  %s17_s14 = int_to_ptr.vmem [resolvable:$true] %s16_s14 }
   0x2   :  { %s243_s15 = scalar_lea.vmem %s17_s14, 128  ;;  %p248_p1 = scmp.lt.s32.totalorder %s17_s14, %s17_s14 }
   0x3   :  { %p244_p0 = scmp.ne.s32.totalorder %s17_s14, %s243_s15  ;;  %p249_p2 = scmp.lt.s32.totalorder %s243_s15, %s243_s15 }
   0x5   :  { %p250_p3 = por %p249_p2, %p248_p1 }
   0x7   :  { %p251_p4 = pnand %p250_p3, %p244_p0 }
   0x9   :  { %254 = shalt.err (!%p251_p4)
}
   0xa   :  { %s281_s16 = smov [#allocation2]  }
   0xb   :  { %19 = dma.vmem_to_smem %s17_s14, 128, %s281_s16, [#allocation4]  }
   0xc   :  { %277 = dma.done.wait [#allocation4], 128  }
   0xd   :  { %278 = vsyncadd [#allocation4], 4294967168 }
   0xe   :  { %27 = sfence }
   0xf   :  { %v31_v0 = vld [vmem:[%s448_s2] sm:$0x1]  ;;  %s34_s19 = sld [smem:[#allocation2]]  ;;  %v64_v2 = vld [vmem:[%s448_s2 + $0x1] sm:$0x1]  ;;  %s215_s22 = sld [smem:[#allocation2 + $0x1]] }
  0x10   :  { %v32_v1 = vmax.f32 %v31_v0, 0.0  ;;  %s208_s0 = sld [smem:[#allocation2 + $0x80]]  ;;  %v65_v4 = vmax.f32 %v64_v2, 0.0  ;;  %s216_s24 = sld [smem:[#allocation2 + $0x81]]  ;;  %v97_v5 = vld [vmem:[%s448_s2 + $0x2] sm:$0x1] }
  0x11   :  { %s314_s23 = sld [smem:[#allocation2 + $0x200]]  ;;  %s319_s27 = sld [smem:[#allocation2 + $0x201]]  ;;  %v98_v9 = vmax.f32 %v97_v5, 0.0  ;;  %v130_v13 = vld [vmem:[%s448_s2 + $0x3] sm:$0x1]  ;;  %vm189_vm2 = vcmask 1040384  }
  0x12   :  { %v312_v3 = vmin.f32 %v32_v1, 1.0  ;;  %v322_v8 = vmin.f32 %v65_v4, 1.0  ;;  %s324_s28 = sld [smem:[#allocation2 + $0x2]]  ;;  %s326_s30 = sld [smem:[#allocation2 + $0x180]]  ;;  %v131_v20 = vmax.f32 %v130_v13, 0.0  ;;  %vm191_vm3 = vcmask 123904  }
  0x13   :  { %s224_s29 = sld [smem:[#allocation2 + $0x82]]  ;;  %s330_s5 = sld [smem:[#allocation2 + $0x181]]  ;;  %v342_v16 = vmin.f32 %v98_v9, 1.0  ;;  %v372_v27 = vld [vmem:[%s447_s1] sm:$0x1] }
  0x14   :  { %s328_s4 = sld [smem:[#allocation2 + $0x202]]  ;;  %s335_s8 = sld [smem:[#allocation2 + $0x100]]  ;;  %v377_v30 = vmin.f32 %v131_v20, 1.0  ;;  %v30_v34 = vand.u32 2147483647, %v372_v27 }
  0x15   :  { %v44_v10 = vstv %s34_s19  ;;  %v77_v12 = vstv %s215_s22  ;;  %s337_s9 = sld [smem:[#allocation2 + $0x380]]  ;;  %s346_s10 = sld [smem:[#allocation2 + $0x3]] }
  0x16   :  { %v42_v6 = vstv %s208_s0  ;;  %v75_v11 = vstv %s216_s24  ;;  %s348_s11 = sld [smem:[#allocation2 + $0x83]]  ;;  %s350_s2 = sld [smem:[#allocation2 + $0x101]] }
  0x17   :  { %v43_v7 = vmul.f32 %v42_v6, %v312_v3  ;;  %v76_v15 = vmul.f32 %v75_v11, %v322_v8  ;;  %v46_v17 = vstv %s314_s23  ;;  %v79_v18 = vstv %s319_s27  ;;  %s352_s12 = sld [smem:[#allocation2 + $0x381]]  ;;  %s356_s13 = sld [smem:[#allocation2 + $0x182]] }
  0x18   :  { %v110_v22 = vstv %s324_s28  ;;  %s359_s14 = sld [smem:[#allocation2 + $0x203]]  ;;  %s364_s15 = sld [smem:[#allocation2 + $0x300]]  ;;  %v49_v28 = vstv %s326_s30 }
  0x19   :  { %v339_v14 = vadd.f32 %v44_v10, %v43_v7  ;;  %v354_v19 = vadd.f32 %v77_v12, %v76_v15  ;;  %v108_v21 = vstv %s224_s29  ;;  %s366_s16 = sld [smem:[#allocation2 + $0x301]]  ;;  %v82_v31 = vstv %s330_s5  ;;  %s380_s19 = sld [smem:[#allocation2 + $0x102]] }
  0x1a   :  { %v109_v25 = vmul.f32 %v108_v21, %v342_v16  ;;  %v112_v26 = vstv %s328_s4  ;;  %s382_s0 = sld [smem:[#allocation2 + $0x382]]  ;;  %s385_s20 = sld [smem:[#allocation2 + $0x183]]  ;;  %v50_v35 = vmul.f32 %v49_v28, %v312_v3  ;;  %v51_v38 = vstv %s335_s8 }
  0x1b   :  { %v47_v23 = vmul.f32 %v46_v17, %v339_v14  ;;  %v80_v24 = vmul.f32 %v79_v18, %v354_v19  ;;  %v143_v37 = vstv %s346_s10  ;;  %v53_v39 = vstv %s337_s9  ;;  %s397_s21 = sld [smem:[#allocation2 + $0x302]]  ;;  %s401_s22 = sld [smem:[#allocation2 + $0x103]] }
  0x1c   :  { %v375_v29 = vadd.f32 %v110_v22, %v109_v25  ;;  %v141_v36 = vstv %s348_s11  ;;  %v83_v40 = vmul.f32 %v82_v31, %v322_v8  ;;  %v84_v42 = vstv %s350_s2  ;;  %s403_s23 = sld [smem:[#allocation2 + $0x383]]  ;;  %s212_s25 = sld [smem:[#allocation2 + $0x280]] }
  0x1d   :  { %v81_v32 = vadd.f32 %v80_v24, %v47_v23  ;;  %v142_v41 = vmul.f32 %v141_v36, %v377_v30  ;;  %v86_v43 = vstv %s352_s12  ;;  %v115_v44 = vstv %s356_s13  ;;  %s410_s24 = sld [smem:[#allocation2 + $0x303]]  ;;  %s220_s26 = sld [smem:[#allocation2 + $0x281]] }
  0x1e   :  { %v113_v33 = vmul.f32 %v112_v26, %v375_v29  ;;  %v145_v45 = vstv %s359_s14  ;;  %v52_v48 = vadd.f32 %v51_v38, %v50_v35  ;;  %v54_v49 = vmul.f32 %v53_v39, %v30_v34  ;;  %s228_s27 = sld [smem:[#allocation2 + $0x282]]  ;;  %s236_s28 = sld [smem:[#allocation2 + $0x283]] }
  0x1f   :  { %v144_v47 = vadd.f32 %v143_v37, %v142_v41  ;;  %v57_v50 = vstv %s364_s15  ;;  %v90_v51 = vstv %s366_s16  ;;  %v85_v52 = vadd.f32 %v84_v42, %v83_v40  ;;  %s282_s4 = smov [#allocation5]  }
  0x20   :  { %v114_v46 = vadd.f32 %v113_v33, %v81_v32  ;;  %v87_v53 = vmul.f32 %v86_v43, %v30_v34  ;;  %v116_v54 = vmul.f32 %v115_v44, %v342_v16  ;;  %v117_v56 = vstv %s380_s19  ;;  %s199_s5 = sshll.u32 %s282_s4, 4  ;;  %s200_s5 = int_to_ptr.vmem [resolvable:$true] %s199_s5 }
  0x21   :  { %v146_v55 = vmul.f32 %v145_v45, %v144_v47  ;;  %v119_v57 = vstv %s382_s0  ;;  %v148_v59 = vstv %s385_s20  ;;  %v55_v60 = vsub.f32 %v52_v48, %v54_v49  ;;  %p260_p6 = scmp.lt.s32.totalorder %s200_s5, %s200_s5 }
  0x22   :  { %v58_v61 = vmul.f32 %v57_v50, %v312_v3  ;;  %v91_v62 = vmul.f32 %v90_v51, %v322_v8  ;;  %v88_v63 = vsub.f32 %v85_v52, %v87_v53  ;;  %v118_v0 = vadd.f32 %v117_v56, %v116_v54 }
  0x23   :  { %v147_v58 = vadd.f32 %v146_v55, %v114_v46  ;;  %v120_v1 = vmul.f32 %v119_v57, %v30_v34  ;;  %v123_v4 = vstv %s397_s21  ;;  %v149_v5 = vmul.f32 %v148_v59, %v377_v30 }
  0x24   :  { %v150_v6 = vstv %s401_s22  ;;  %v152_v7 = vstv %s403_s23  ;;  %v56_v9 = vmul.f32 %v55_v60, %v339_v14  ;;  %v59_v10 = vmul.f32 %v58_v61, %v312_v3 }
  0x25   :  { %v166_v2 = vmul.f32 0.004, %v147_v58  ;;  %v89_v11 = vmul.f32 %v88_v63, %v354_v19  ;;  %v92_v12 = vmul.f32 %v91_v62, %v322_v8  ;;  %v121_v13 = vsub.f32 %v118_v0, %v120_v1 }
  0x26   :  { %v124_v15 = vmul.f32 %v123_v4, %v342_v16  ;;  %v151_v17 = vadd.f32 %v150_v6, %v149_v5  ;;  %v153_v18 = vmul.f32 %v152_v7, %v30_v34  ;;  %v156_v20 = vstv %s410_s24 }
  0x27   :  { %241 = vrsqrt.f32 %v166_v2  ;;  %v60_v21 = vadd.f32 %v59_v10, %v56_v9  ;;  %v61_v22 = vstv %s212_s25  ;;  %v93_v23 = vadd.f32 %v92_v12, %v89_v11 }
  0x28   :  { %v122_v24 = vmul.f32 %v121_v13, %v375_v29  ;;  %v125_v14 = vmul.f32 %v124_v15, %v342_v16  ;;  %v94_v25 = vstv %s220_s26  ;;  %v154_v3 = vsub.f32 %v151_v17, %v153_v18 }
  0x29   :  { %v157_v19 = vmul.f32 %v156_v20, %v377_v30  ;;  %v62_v8 = vmul.f32 %v61_v22, %v60_v21  ;;  %v163_v26 = vadd.f32 5.0, %v147_v58  ;;  %v95_v31 = vmul.f32 %v94_v25, %v93_v23 }
  0x2a   :  { %v126_v32 = vadd.f32 %v125_v14, %v122_v24  ;;  %vm169_vm0 = vcmp.eq.f32.partialorder %v166_v2, inf  ;;  %v172_v33 = vand.u32 2147483648, %v166_v2  ;;  %v155_v34 = vmul.f32 %v154_v3, %v144_v47 }
  0x2b   :  { %v158_v35 = vmul.f32 %v157_v19, %v377_v30  ;;  %vm171_vm1 = vcmp.eq.f32.partialorder %v166_v2, 0.0  ;;  %v127_v29 = vstv %s228_s27  ;;  %v164_v37 = vsub.f32 0.0, %v163_v26  ;;  %v29_v30 = vld [vmem:[%s447_s1 + $0x1] sm:$0x1]  ;;  %s255_s1 = scalar_lea.vmem %s200_s5, 32 }
  0x2c   :  { %v96_v39 = vadd.f32 %v95_v31, %v62_v8  ;;  %v128_v40 = vmul.f32 %v127_v29, %v126_v32  ;;  %v160_v43 = vstv %s236_s28  ;;  %v178_v54 = vmul.f32 0.016666668, %v29_v30  ;;  %p256_p5 = scmp.ne.s32.totalorder %s200_s5, %s255_s1  ;;  %p261_p7 = scmp.lt.s32.totalorder %s255_s1, %s255_s1 }
  0x2d   :  { %v159_v41 = vadd.f32 %v158_v35, %v155_v34  ;;  %v165_v44 = vmul.f32 250.0, %v164_v37 }
  0x2e   :  { %v129_v46 = vadd.f32 %v128_v40, %v96_v39  ;;  %v179_v57 = vadd.f32 %v178_v54, %v372_v27  ;;  %p262_p8 = por %p261_p7, %p260_p6 }
  0x2f   :  { %v161_v48 = vmul.f32 %v160_v43, %v159_v41  ;;  %v180_v50 = vmul.f32 %v165_v44, %v372_v27 }
  0x30   :  { %p263_p9 = pnand %p262_p8, %p256_p5 }
  0x31   :  { %v242_v28 = vpop.eup %241  ;;  %v162_v51 = vadd.f32 %v161_v48, %v129_v46 }
  0x32   :  { %v168_v36 = vmul.f32 %v242_v28, %v166_v2 }
  0x34   :  { %v170_v16 = vsel %vm169_vm0, %v166_v2, %v168_v36 }
  0x35   :  { %v173_v38 = vsel %vm171_vm1, %v172_v33, %v170_v16 }
  0x36   :  { %v174_v42 = vmul.f32 2.0, %v173_v38 }
  0x38   :  { %v175_v45 = vadd.f32 0.3, %v174_v42 }
  0x3a   :  { %v176_v49 = vsub.f32 0.0, %v175_v45 }
  0x3c   :  { %v177_v47 = vmul.f32 250.0, %v176_v49 }
  0x3e   :  { %v181_v52 = vmul.f32 %v177_v47, %v29_v30 }
  0x40   :  { %v182_v53 = vadd.f32 %v181_v52, %v180_v50 }
  0x42   :  { %v183_v55 = vadd.f32 %v182_v53, %v162_v51 }
  0x44   :  { %v184_v56 = vmul.f32 0.016666668, %v183_v55 }
  0x46   :  { %v185_v58 = vadd.f32 %v184_v56, %v29_v30 }
  0x48   :  { %v187_v59 = vrot.slane %v185_v58, 7 }
  0x4a   :  { %v190_v60 = vsel %vm189_vm2, %v179_v57, %v187_v59 }
  0x4b   :  { %192 = vst.msk [vmem:[#allocation5] sm:$0x3] %vm191_vm3, %v190_v60 }
  0x4c   :  { %266 = shalt.err (!%p263_p9)
}
  0x4d   :  { %s267_s8 = scalar_lea.hbm %s449_s3, 32 }
  0x4e   :  { %p268_p10 = scmp.ne.s32.totalorder %s449_s3, %s267_s8  ;;  %p271_p11 = scmp.lt.u32.totalorder %s267_s8, %s449_s3 }
  0x50   :  { %p273_p12 = pnand %p271_p11, %p268_p10 }
  0x52   :  { %276 = shalt.err (!%p273_p12)
}
  0x53   :  { %202 = dma.vmem_to_hbm [thread:$0]  %s200_s5, 32, %s449_s3, [#allocation3]  }
  0x54   :  { %279 = dma.done.wait [#allocation3], 32  }
  0x55   :  { %280 = vsyncadd [#allocation3], 4294967264 }
  0x56   :  { %206 = vsyncpa [#allocation3], 1 }
  0x57   :  { %207 = vsyncpa [#allocation4], 1 }

</bundles_post_ra>
